<compile_context>
chip_gen: v7x
topology: tpu7x:2x2x1
jax: 0.10.0
libtpu: 0.0.40
codegen_flags: <defaults>
</compile_context>

<pallas_src>
import functools

import numpy as np
import jax
import jax.numpy as jnp
from jax import lax
from jax.experimental import pallas as pl
from jax.experimental.pallas import tpu as pltpu


def _semantic_edge_kernel(x_ref, halo_ref, out_ref, work_ref, *,
                          tile_h, W, H, r, halo_h, off, pix, ignore):
    i = pl.program_id(0)

    # ---- assemble ignore-masked, replication-padded row window in VMEM -----
    x = x_ref[...]                                    # (tile_h, W)
    x = jnp.where(x == ignore, 0.0, x)
    halo = halo_ref[0]                                # (2*halo_h, W)
    halo = jnp.where(halo == ignore, 0.0, halo)
    work_ref[off:off + tile_h, :] = x                 # sublane-aligned store
    work_ref[off - halo_h:off, :] = halo[:halo_h]
    work_ref[off + tile_h:off + tile_h + halo_h, :] = halo[halo_h:]

    # ---- 3x3 Laplacian [[0,-1,0],[-1,4,-1],[0,-1,0]] over tile_h + 2r rows -
    L = tile_h + 2 * r
    base = off - r
    c = work_ref[base:base + L, :]
    up = work_ref[base - 1:base + L - 1, :]
    dn = work_ref[base + 1:base + L + 1, :]

    col = lax.broadcasted_iota(jnp.int32, (L, W), 1)
    lf = pltpu.roll(c, shift=1, axis=1)               # x[:, j-1]
    lf = jnp.where(col == 0, c, lf)                   # replication at left edge
    rt = pltpu.roll(c, shift=W - 1, axis=1)           # x[:, j+1]
    rt = jnp.where(col == W - 1, c, rt)               # replication at right edge

    lap = 4.0 * c - up - dn - lf - rt
    binary = jnp.where(lap != 0.0, 1.0, 0.0)

    # Rows outside the image contribute 0 to the max-pool.  Zero padding is
    # equivalent to torch's implicit -inf pad here: binary >= 0 and every
    # pooling window contains at least one in-image element.
    row = lax.broadcasted_iota(jnp.int32, (L, W), 0)
    g = row + (i * tile_h - r)                        # global binary row index
    binary = jnp.where((g >= 0) & (g < H), binary, 0.0)

    # ---- separable max-pool (kernel=pix, stride=1, padding=r) --------------
    # horizontal via lane rolls (XLU) + boundary masks, vertical via shifted
    # row slices: 2*(pix-1) maxima instead of pix^2-1 shifted VMEM reads.
    hmax = binary
    for d in range(1, r + 1):
        left = jnp.where(col >= d, pltpu.roll(binary, shift=d, axis=1), 0.0)
        right = jnp.where(col <= W - 1 - d,
                          pltpu.roll(binary, shift=W - d, axis=1), 0.0)
        hmax = jnp.maximum(hmax, jnp.maximum(left, right))

    vmax = hmax[0:tile_h]
    for dy in range(1, pix):
        vmax = jnp.maximum(vmax, hmax[dy:dy + tile_h])
    out_ref[...] = vmax                               # full-width aligned store


def _pick_tile_h(H, W):
    # Keep the per-step footprint (~5 f32 row blocks, incl. double buffers and
    # the work scratch) under ~12 MiB so the default scoped VMEM limit is fine
    # on v5e/v6e/v7x.
    budget_rows = max(8, (12 * 1024 * 1024) // (20 * W))
    for cand in (256, 128, 64, 32, 16, 8):
        if cand <= budget_rows and H % cand == 0:
            return cand
    return H                                          # fallback: single row-tile


def get_semantic_edge(seg_label, ignore_index, pix=3):
    assert pix >= 3
    # TODO(synk): even pix changes the output shape to (H+1, W+1); only the
    # odd-pix case (the module default pix=3) is supported by the tiled kernel.
    assert pix % 2 == 1
    seg = jnp.asarray(seg_label, jnp.float32)
    H, W = seg.shape
    r = pix // 2
    halo_h = r + 1                     # pool halo (r) + 1 row for the Laplacian
    tile_h = _pick_tile_h(H, W)
    n_tiles = H // tile_h
    padt = ((halo_h + 7) // 8) * 8     # sublane-aligned offset of the tile core

    # Tiny per-tile slab of replication-clamped halo rows: fuses the
    # ReplicationPad2d(1) row padding into the kernel.  HBM cost is
    # n_tiles * 2*halo_h rows (negligible vs. the full image).
    tiles = jnp.arange(n_tiles, dtype=jnp.int32)[:, None] * tile_h
    top_idx = tiles + jnp.arange(-halo_h, 0, dtype=jnp.int32)[None, :]
    bot_idx = tiles + tile_h + jnp.arange(0, halo_h, dtype=jnp.int32)[None, :]
    halo_idx = jnp.clip(jnp.concatenate([top_idx, bot_idx], axis=1), 0, H - 1)
    halo = jnp.take(seg, halo_idx, axis=0)            # (n_tiles, 2*halo_h, W)

    kernel = functools.partial(
        _semantic_edge_kernel, tile_h=tile_h, W=W, H=H, r=r, halo_h=halo_h,
        off=padt, pix=pix, ignore=float(ignore_index))

    cost = pl.CostEstimate(
        flops=int((16 + 2 * pix) * H * W),
        transcendentals=0,
        bytes_accessed=int(4 * (2 * H * W + n_tiles * 2 * halo_h * W)),
    )

    out = pl.pallas_call(
        kernel,
        out_shape=jax.ShapeDtypeStruct((H, W), jnp.float32),
        grid=(n_tiles,),
        in_specs=[
            pl.BlockSpec((tile_h, W), lambda i: (i, 0)),
            pl.BlockSpec((1, 2 * halo_h, W), lambda i: (i, 0, 0)),
        ],
        out_specs=pl.BlockSpec((tile_h, W), lambda i: (i, 0)),
        scratch_shapes=[pltpu.VMEM((tile_h + 2 * padt, W), jnp.float32)],
        compiler_params=pltpu.CompilerParams(
            dimension_semantics=("parallel",)),
        cost_estimate=cost,
    )(seg, halo)
    return out


def _reference(seg_label, ignore_index, pix=3):
    x = np.asarray(seg_label, np.float32).copy()
    x[x == ignore_index] = 0
    H, W = x.shape
    xp = np.pad(x, 1, mode="edge")
    lap = (4.0 * xp[1:H + 1, 1:W + 1]
           - xp[0:H, 1:W + 1] - xp[2:H + 2, 1:W + 1]
           - xp[1:H + 1, 0:W] - xp[1:H + 1, 2:W + 2])
    binary = (lap != 0).astype(np.float32)
    r = pix // 2
    pb = np.pad(binary, r, mode="constant")
    out = np.zeros((H, W), np.float32)
    for i in range(H):
        for j in range(W):
            out[i, j] = pb[i:i + pix, j:j + pix].max()
    return out


if __name__ == "__main__":
    key = jax.random.PRNGKey(0)
    k1, k2 = jax.random.split(key)
    # small, but exercises the multi-tile path (3 row tiles) and a 128-lane width
    H, W = 48, 128
    ignore_index = 255

    labels = jax.random.randint(k1, (H, W), 0, 4).astype(jnp.float32)
    ignore_mask = jax.random.bernoulli(k2, 0.1, (H, W))
    seg_label = jnp.where(ignore_mask, float(ignore_index), labels)

    out = get_semantic_edge(seg_label, ignore_index, pix=3)
    out = jax.block_until_ready(out)

    ref = _reference(np.asarray(seg_label), ignore_index, pix=3)
    np.testing.assert_allclose(np.asarray(out), ref, atol=0, rtol=0)
    print("KERNEL_OK")
</pallas_src>

<mosaic_0001>
module attributes {stable_mosaic.version = 11 : i64} {
  func.func @_semantic_edge_kernel(%arg0: i32, %arg1: memref<16x128xf32, #tpu.memory_space<vmem>>, %arg2: memref<1x4x128xf32, #tpu.memory_space<vmem>>, %arg3: memref<16x128xf32, #tpu.memory_space<vmem>>, %arg4: memref<32x128xf32, #tpu.memory_space<vmem>>) attributes {dimension_semantics = [#tpu.dimension_semantics<parallel>], iteration_bounds = array<i64: 3>, scalar_prefetch = 0 : i64, scratch_operands = 1 : i64, tpu.core_type = #tpu.core_type<tc>, window_params = [{transform_indices = @transform_0, window_bounds = array<i64: 16, 128>}, {transform_indices = @transform_1, window_bounds = array<i64: 1, 4, 128>}, {transform_indices = @transform_2, window_bounds = array<i64: 16, 128>}]} {
    %c0 = arith.constant 0 : index
    %c0_0 = arith.constant 0 : index
    %0 = vector.load %arg1[%c0, %c0_0] : memref<16x128xf32, #tpu.memory_space<vmem>>, vector<16x128xf32>
    %cst = arith.constant 2.550000e+02 : f32
    %1 = vector.broadcast %cst : f32 to vector<16x128xf32>
    %2 = arith.cmpf oeq, %0, %1 : vector<16x128xf32>
    %cst_1 = arith.constant 0.000000e+00 : f32
    %3 = vector.broadcast %cst_1 : f32 to vector<16x128xf32>
    %4 = arith.select %2, %3, %0 : vector<16x128xi1>, vector<16x128xf32>
    %c0_2 = arith.constant 0 : index
    %c0_3 = arith.constant 0 : index
    %c0_4 = arith.constant 0 : index
    %5 = vector.load %arg2[%c0_2, %c0_3, %c0_4] : memref<1x4x128xf32, #tpu.memory_space<vmem>>, vector<1x4x128xf32>
    %6 = vector.shape_cast %5 : vector<1x4x128xf32> to vector<4x128xf32>
    %cst_5 = arith.constant 2.550000e+02 : f32
    %7 = vector.broadcast %cst_5 : f32 to vector<4x128xf32>
    %8 = arith.cmpf oeq, %6, %7 : vector<4x128xf32>
    %cst_6 = arith.constant 0.000000e+00 : f32
    %9 = vector.broadcast %cst_6 : f32 to vector<4x128xf32>
    %10 = arith.select %8, %9, %6 : vector<4x128xi1>, vector<4x128xf32>
    %c8 = arith.constant 8 : index
    %c0_7 = arith.constant 0 : index
    %11 = vector.load %arg4[%c8, %c0_7] : memref<32x128xf32, #tpu.memory_space<vmem>>, vector<16x128xf32>
    tpu.vector_store %arg4[%c8, %c0_7], %4 {strides = array<i32>} : memref<32x128xf32, #tpu.memory_space<vmem>>, vector<16x128xf32>,
    %12 = vector.extract_strided_slice %10 {offsets = [0, 0], sizes = [2, 128], strides = [1, 1]} : vector<4x128xf32> to vector<2x128xf32>
    %c6 = arith.constant 6 : index
    %c0_8 = arith.constant 0 : index
    %13 = vector.load %arg4[%c6, %c0_8] : memref<32x128xf32, #tpu.memory_space<vmem>>, vector<2x128xf32>
    tpu.vector_store %arg4[%c6, %c0_8], %12 {strides = array<i32>} : memref<32x128xf32, #tpu.memory_space<vmem>>, vector<2x128xf32>,
    %14 = vector.extract_strided_slice %10 {offsets = [2, 0], sizes = [2, 128], strides = [1, 1]} : vector<4x128xf32> to vector<2x128xf32>
    %c24 = arith.constant 24 : index
    %c0_9 = arith.constant 0 : index
    %15 = vector.load %arg4[%c24, %c0_9] : memref<32x128xf32, #tpu.memory_space<vmem>>, vector<2x128xf32>
    tpu.vector_store %arg4[%c24, %c0_9], %14 {strides = array<i32>} : memref<32x128xf32, #tpu.memory_space<vmem>>, vector<2x128xf32>,
    %c7 = arith.constant 7 : index
    %c0_10 = arith.constant 0 : index
    %16 = vector.load %arg4[%c7, %c0_10] : memref<32x128xf32, #tpu.memory_space<vmem>>, vector<18x128xf32>
    %c6_11 = arith.constant 6 : index
    %c0_12 = arith.constant 0 : index
    %17 = vector.load %arg4[%c6_11, %c0_12] : memref<32x128xf32, #tpu.memory_space<vmem>>, vector<18x128xf32>
    %c8_13 = arith.constant 8 : index
    %c0_14 = arith.constant 0 : index
    %18 = vector.load %arg4[%c8_13, %c0_14] : memref<32x128xf32, #tpu.memory_space<vmem>>, vector<18x128xf32>
    %19 = tpu.iota {dimensions = array<i32: 1>} : vector<18x128xi32>
    %c1_i32 = arith.constant 1 : i32
    %20 = tpu.dynamic_rotate %16 by %c1_i32 dim 1 : vector<18x128xf32>, i32 -> vector<18x128xf32>
    %c0_i32 = arith.constant 0 : i32
    %21 = vector.broadcast %c0_i32 : i32 to vector<18x128xi32>
    %22 = arith.cmpi eq, %19, %21 : vector<18x128xi32>
    %23 = arith.select %22, %16, %20 : vector<18x128xi1>, vector<18x128xf32>
    %c127_i32 = arith.constant 127 : i32
    %24 = tpu.dynamic_rotate %16 by %c127_i32 dim 1 : vector<18x128xf32>, i32 -> vector<18x128xf32>
    %c127_i32_15 = arith.constant 127 : i32
    %25 = vector.broadcast %c127_i32_15 : i32 to vector<18x128xi32>
    %26 = arith.cmpi eq, %19, %25 : vector<18x128xi32>
    %27 = arith.select %26, %16, %24 : vector<18x128xi1>, vector<18x128xf32>
    %cst_16 = arith.constant 4.000000e+00 : f32
    %28 = vector.broadcast %cst_16 : f32 to vector<18x128xf32>
    %29 = arith.mulf %28, %16 : vector<18x128xf32>
    %30 = arith.subf %29, %17 : vector<18x128xf32>
    %31 = arith.subf %30, %18 : vector<18x128xf32>
    %32 = arith.subf %31, %23 : vector<18x128xf32>
    %33 = arith.subf %32, %27 : vector<18x128xf32>
    %cst_17 = arith.constant 0.000000e+00 : f32
    %34 = vector.broadcast %cst_17 : f32 to vector<18x128xf32>
    %35 = arith.cmpf one, %33, %34 : vector<18x128xf32>
    %cst_18 = arith.constant 1.000000e+00 : f32
    %cst_19 = arith.constant 0.000000e+00 : f32
    %36 = vector.broadcast %cst_18 : f32 to vector<18x128xf32>
    %37 = vector.broadcast %cst_19 : f32 to vector<18x128xf32>
    %38 = arith.select %35, %36, %37 : vector<18x128xi1>, vector<18x128xf32>
    %39 = tpu.iota {dimensions = array<i32: 0>} : vector<18x128xi32>
    %c16_i32 = arith.constant 16 : i32
    %40 = arith.muli %arg0, %c16_i32 : i32
    %c1_i32_20 = arith.constant 1 : i32
    %41 = arith.subi %40, %c1_i32_20 : i32
    %42 = vector.broadcast %41 : i32 to vector<18x128xi32>
    %43 = arith.addi %39, %42 : vector<18x128xi32>
    %c0_i32_21 = arith.constant 0 : i32
    %44 = vector.broadcast %c0_i32_21 : i32 to vector<18x128xi32>
    %45 = arith.cmpi sge, %43, %44 : vector<18x128xi32>
    %c48_i32 = arith.constant 48 : i32
    %46 = vector.broadcast %c48_i32 : i32 to vector<18x128xi32>
    %47 = arith.cmpi slt, %43, %46 : vector<18x128xi32>
    %48 = arith.andi %45, %47 : vector<18x128xi1>
    %cst_22 = arith.constant 0.000000e+00 : f32
    %49 = vector.broadcast %cst_22 : f32 to vector<18x128xf32>
    %50 = arith.select %48, %38, %49 : vector<18x128xi1>, vector<18x128xf32>
    %c1_i32_23 = arith.constant 1 : i32
    %51 = vector.broadcast %c1_i32_23 : i32 to vector<18x128xi32>
    %52 = arith.cmpi sge, %19, %51 : vector<18x128xi32>
    %c1_i32_24 = arith.constant 1 : i32
    %53 = tpu.dynamic_rotate %50 by %c1_i32_24 dim 1 : vector<18x128xf32>, i32 -> vector<18x128xf32>
    %cst_25 = arith.constant 0.000000e+00 : f32
    %54 = vector.broadcast %cst_25 : f32 to vector<18x128xf32>
    %55 = arith.select %52, %53, %54 : vector<18x128xi1>, vector<18x128xf32>
    %c126_i32 = arith.constant 126 : i32
    %56 = vector.broadcast %c126_i32 : i32 to vector<18x128xi32>
    %57 = arith.cmpi sle, %19, %56 : vector<18x128xi32>
    %c127_i32_26 = arith.constant 127 : i32
    %58 = tpu.dynamic_rotate %50 by %c127_i32_26 dim 1 : vector<18x128xf32>, i32 -> vector<18x128xf32>
    %cst_27 = arith.constant 0.000000e+00 : f32
    %59 = vector.broadcast %cst_27 : f32 to vector<18x128xf32>
    %60 = arith.select %57, %58, %59 : vector<18x128xi1>, vector<18x128xf32>
    %61 = arith.maximumf %55, %60 : vector<18x128xf32>
    %62 = arith.maximumf %50, %61 : vector<18x128xf32>
    %63 = vector.extract_strided_slice %62 {offsets = [0, 0], sizes = [16, 128], strides = [1, 1]} : vector<18x128xf32> to vector<16x128xf32>
    %64 = vector.extract_strided_slice %62 {offsets = [1, 0], sizes = [16, 128], strides = [1, 1]} : vector<18x128xf32> to vector<16x128xf32>
    %65 = arith.maximumf %63, %64 : vector<16x128xf32>
    %66 = vector.extract_strided_slice %62 {offsets = [2, 0], sizes = [16, 128], strides = [1, 1]} : vector<18x128xf32> to vector<16x128xf32>
    %67 = arith.maximumf %65, %66 : vector<16x128xf32>
    %c0_28 = arith.constant 0 : index
    %c0_29 = arith.constant 0 : index
    %68 = vector.load %arg3[%c0_28, %c0_29] : memref<16x128xf32, #tpu.memory_space<vmem>>, vector<16x128xf32>
    tpu.vector_store %arg3[%c0_28, %c0_29], %67 {strides = array<i32>} : memref<16x128xf32, #tpu.memory_space<vmem>>, vector<16x128xf32>,
    return
  }
  func.func @transform_0(%arg0: i32) -> (i32, i32) {
    %c0_i32 = arith.constant 0 : i32
    %c0_i32_0 = arith.constant 0 : i32
    return %arg0, %c0_i32 : i32, i32
  }
  func.func @transform_1(%arg0: i32) -> (i32, i32, i32) {
    %c0_i32 = arith.constant 0 : i32
    %c0_i32_0 = arith.constant 0 : i32
    %c0_i32_1 = arith.constant 0 : i32
    return %arg0, %c0_i32, %c0_i32_0 : i32, i32, i32
  }
  func.func @transform_2(%arg0: i32) -> (i32, i32) {
    %c0_i32 = arith.constant 0 : i32
    %c0_i32_0 = arith.constant 0 : i32
    return %arg0, %c0_i32 : i32, i32
  }
}

</mosaic_0001>

<bundles_post_ra>
// kernel: tpu_custom_call.1
= control target key start
LH: loop header
LB: loop body
LE: loop exit
PB: predicated region body
PF: predicated region fallthrough
CT: control target
= control target key end

     0   :  { %7 = vsyncpa [#allocation4], 0  ;;  %s931_s0 = inlined_call_operand.hbm [shape: f32[48,128], index: 0, kind: input, shape index: {}]   ;;  %s932_s1 = inlined_call_operand.hbm [shape: f32[3,4,128], index: 1, kind: input, shape index: {}]   ;;  %s933_s2 = inlined_call_operand.hbm [shape: f32[48,128], index: 2, kind: output, shape index: {}]  }
   0x1   :  { %9 = vsyncpa [#allocation4 + $0x1], 0 }
   0x2   :  { %10 = vsyncpa [#allocation7], 0 }
   0x3   :  { %12 = vsyncpa [#allocation7 + $0x1], 0 }
   0x4   :  { %13 = vsyncpa [#allocation5], 0 }
   0x5   :  { %15 = vsyncpa [#allocation5 + $0x1], 0  ;;  %s695_s9 = smov 0   ;;  %s697_s10 = smov 0  }
   0x6   :  { %s699_s11 = smov 0   ;;  %s701_s12 = smov 0  }
   0x7 LB: > { %s716_s13 = sadd.s32 4294967295, %s668_s12   ;;  %s449_s14 = sadd.s32 4294967294, %s668_s12   ;;  %s668_s12 = sphi %s701_s12, %s949_s12   ;;  %s664_s11 = sphi %s699_s11, %s948_s11   ;;  %s660_s10 = sphi %s697_s10, %s947_s10   ;;  %s656_s9 = sphi %s695_s9, %s946_s9  }
   0x8   : > { %s720_s15 = sadd.s32 1, %s668_s12   ;;  %s28_s16 = sadd.s32 1, %s664_s11 }
   0x9   : > { %s25_s17 = ssub.s32 %s668_s12, %s720_s15  ;;  %p35_p0 = scmp.ne.s32.totalorder %s664_s11, %s660_s10 }
   0xa   : > { %p26_p1 = scmp.eq.s32.totalorder %s25_s17, 0  ;;  %p36_p2 = scmp.eq.s32.totalorder %s668_s12, 0 }
   0xb   : > { %p41_p3 = scmp.ne.s32.totalorder %s660_s10, %s656_s9  ;;  %p42_p4 = scmp.eq.s32.totalorder %s716_s13, 0 }
   0xc   : > { %s732_s18 = scalar_select %p26_p1, %s664_s11, %s28_s16  }
   0xd   : > { %p734_p5 = por %p36_p2, %p35_p0  ;;  %p738_p6 = por %p42_p4, %p41_p3 }
   0xe   : > { %p91_p7 = scmp.eq.s32.totalorder %s716_s13, 2  ;;  %p97_p8 = scmp.eq.s32.totalorder %s449_s14, 2 }
   0xf   : > { %s937_s20 = scalar_select %p738_p6, 1, 0 }
  0x10   : > { %p487_p9 = scmp.lt.s32.totalorder %s668_s12, 3  ;;  %p744_p10 = por %p91_p7, %p35_p0 }
  0x11   : > { %p748_p11 = por %p97_p8, %p41_p3  ;;  %s753_s23 = sand.u32 1, %s664_s11  }
  0x12   : > { %s938_s21 = scalar_select %p744_p10, 1, 0 }
  0x13   : > { %s939_s22 = scalar_select %p748_p11, 1, 0 }
  0x14   : > { %s468_s24 = sshll.u32 %s668_s12, 8  ;;  %s452_s25 = sshll.u32 %s753_s23, 4 }
  0x15   : > { %s760_s28 = scalar_lea.hbm %s931_s0, %s468_s24  ;;  %s121_s29 = scalar_lea.vmem [#allocation3], %s452_s25 }
  0x16   : > { %s128_s30 = sshll.u32 %s121_s29, 4  ;;  %p764_p12 = pnand %p487_p9, %p734_p5  ;;  %s768_s30 = int_to_ptr.vmem [resolvable:$true] %s128_s30 }
  0x17   : > { %s118_s4 = scalar_lea.sflag [#allocation4], %s753_s23  ;;  %s538_s5 = scalar_lea.hbm %s760_s28, 256 }
  0x18   : > { %p539_p13 = scmp.ne.s32.totalorder %s760_s28, %s538_s5  ;;  %p540_p0 = pneg %p764_p12 }
  0x19   : > { %s543_s8 = scalar_lea.hbm %s931_s0, 768  ;;  %p544_p3 = scmp.lt.u32.totalorder %s760_s28, %s931_s0 }
  0x1a   : > { %p541_p1 = pnand %p540_p0, %p539_p13  ;;  %p545_p4 = scmp.lt.u32.totalorder %s543_s8, %s538_s5 }
  0x1b   : > { %p547_p7 = scmp.lt.u32.totalorder %s538_s5, %s760_s28 }
  0x1c   : > { %p542_p2 = pneg %p541_p1  ;;  %p546_p5 = por %p545_p4, %p544_p3 }
  0x1e   : > { %p548_p8 = por %p547_p7, %p546_p5 }
  0x20   : > { %p549_p9 = pnand %p548_p8, %p542_p2 }
  0x22   : > { %552 = shalt.err (!%p549_p9)
}
  0x23   : > { %s553_s17 = scalar_lea.vmem %s768_s30, 256  ;;  %s670_s19 = smov [#allocation3]  }
  0x24   : > { %p554_p13 = scmp.ne.s32.totalorder %s768_s30, %s553_s17  ;;  %s558_s24 = sshll.u32 %s670_s19, 4  ;;  %s559_s24 = int_to_ptr.vmem [resolvable:$false] %s558_s24 }
  0x25   : > { %s560_s25 = scalar_lea.vmem %s559_s24, 512  ;;  %p561_p10 = scmp.lt.s32.totalorder %s768_s30, %s559_s24 }
  0x26   : > { %p556_p1 = pnand %p554_p13, %p540_p0  ;;  %p562_p3 = scmp.lt.s32.totalorder %s560_s25, %s553_s17 }
  0x28   : > { %p557_p11 = pneg %p556_p1  ;;  %p563_p4 = por %p562_p3, %p561_p10 }
  0x2a   : > { %p564_p5 = pnand %p563_p4, %p557_p11 }
  0x2c   : > { %567 = shalt.err (!%p564_p5)
}
  0x2d   : > { %s671_s26 = smov 128   ;;  %s672_s27 = smov 8  }
  0x2e   : > { %479 = dma.hbm_to_vmem [thread:$0]  (!%p764_p12), %s760_s28, 256, %s768_s30, %s118_s4, %s671_s26, %s671_s26, %s672_s27  }
  0x2f   : > { %p457_p2 = scmp.ge.s32.totalorder %s668_s12, 1  ;;  %p154_p7 = scmp.lt.s32.totalorder %s668_s12, 4 }
  0x30   : > { %s455_s29 = sshll.u32 %s753_s23, 2  ;;  %s456_s6 = sshll.u32 %s668_s12, 6 }
  0x31   : > { %p801_p10 = pnand %p457_p2, %p154_p7  ;;  %s142_s7 = scalar_lea.vmem [#allocation6], %s455_s29 }
  0x32   : > { %s149_s8 = sshll.u32 %s142_s7, 4  ;;  %s809_s17 = scalar_lea.hbm %s932_s1, %s456_s6  ;;  %s150_s8 = int_to_ptr.vmem [resolvable:$true] %s149_s8 }
  0x33   : > { %s941_s5 = scalar_select %p801_p10, 1, 0 }
  0x34   : > { %s139_s28 = scalar_lea.sflag [#allocation7], %s753_s23  ;;  %s568_s30 = scalar_lea.hbm %s809_s17, 64 }
  0x35   : > { %p569_p11 = scmp.ne.s32.totalorder %s809_s17, %s568_s30  ;;  %s573_s24 = scalar_lea.hbm %s932_s1, 192 }
  0x36   : > { %p574_p13 = scmp.lt.u32.totalorder %s809_s17, %s932_s1  ;;  %p575_p1 = scmp.lt.u32.totalorder %s573_s24, %s568_s30 }
  0x37   : > { %p571_p8 = pnand %p569_p11, %p540_p0  ;;  %p577_p4 = scmp.lt.u32.totalorder %s568_s30, %s809_s17 }
  0x38   : > { %p576_p3 = por %p575_p1, %p574_p13 }
  0x39   : > { %p572_p9 = pneg %p571_p8 }
  0x3a   : > { %p578_p5 = por %p577_p4, %p576_p3 }
  0x3c   : > { %p579_p2 = pnand %p578_p5, %p572_p9 }
  0x3e   : > { %582 = shalt.err (!%p579_p2)
}
  0x3f   : > { %s583_s23 = scalar_lea.vmem %s150_s8, 64  ;;  %s673_s27 = smov [#allocation6]  }
  0x40   : > { %p584_p7 = scmp.ne.s32.totalorder %s150_s8, %s583_s23  ;;  %s588_s29 = sshll.u32 %s673_s27, 4  ;;  %s589_s29 = int_to_ptr.vmem [resolvable:$false] %s588_s29 }
  0x41   : > { %s590_s6 = scalar_lea.vmem %s589_s29, 128  ;;  %p591_p6 = scmp.lt.s32.totalorder %s150_s8, %s589_s29 }
  0x42   : > { %p586_p11 = pnand %p584_p7, %p540_p0  ;;  %p592_p10 = scmp.lt.s32.totalorder %s590_s6, %s583_s23 }
  0x44   : > { %p587_p8 = pneg %p586_p11  ;;  %p593_p1 = por %p592_p10, %p591_p6 }
  0x46   : > { %p594_p13 = pnand %p593_p1, %p587_p8 }
  0x48   : > { %597 = shalt.err (!%p594_p13)
}
  0x49   : > { %482 = dma.hbm_to_vmem [thread:$0]  (!%p764_p12), %s809_s17, 64, %s150_s8, %s139_s28  }
  0x4a   : > { %p942_p9 = scmp.ne.s32.totalorder %s941_s5, 0 }
  0x4b   : > { %s834_s7 = sand.u32 (!%p942_p9), 1, %s660_s10   ;;  %p943_p6 = scmp.ne.s32.totalorder (!%p942_p9), %s937_s20, 0 }
  0x4c   : > { %158 = sbr.rel (%p942_p9) target bundleno = 378 (0x17a), region = 28  ;;  %s458_s14 = sshll.u32 (!%p942_p9), %s834_s7, 4 }
  0x4d   : > { %s161_s16 = scalar_lea.sflag (!%p942_p9), [#allocation4], %s834_s7  ;;  %s164_s30 = scalar_lea.vmem (!%p942_p9), [#allocation3], %s458_s14 }
  0x53   : > { %643 = dma.done.wait (%p943_p6), %s161_s16, 256  }
  0x54   : > { %645 = vsyncadd (%p943_p6), %s161_s16, 4294967040  ;;  %s459_s3 = sshll.u32 %s834_s7, 2  ;;  %s170_s5 = scalar_lea.sflag [#allocation7], %s834_s7 }
  0x55   : > { %s173_s8 = scalar_lea.vmem [#allocation6], %s459_s3 }
  0x56   : > { %647 = dma.done.wait (%p943_p6), %s170_s5, 64  }
  0x57   : > { %649 = vsyncadd (%p943_p6), %s170_s5, 4294967232  ;;  %v202_v0 = vld [vmem:[%s164_s30 + $0x8] sm:$0xff]  ;;  %v207_v1 = vld [vmem:[%s173_s8] sm:$0xf]  ;;  %s674_s17 = smov 1   ;;  %s675_s20 = smov 127   ;;  %v223_v9 = vlaneseq }
  0x58   : > { %v201_v2 = vld [vmem:[%s164_s30] sm:$0xff]  ;;  %vm204_vm0 = vcmp.eq.f32.partialorder %v202_v0, 255.0  ;;  %vm208_vm1 = vcmp.eq.f32.partialorder %v207_v1, 255.0  ;;  %s461_s28 = sshll.u32 %s716_s13, 4  ;;  %v676_v49 = vmov 0.0   ;;  %s469_s19 = sshll.u32 %s716_s13, 8 }
  0x59   : > { %vm203_vm2 = vcmp.eq.f32.partialorder %v201_v2, 255.0  ;;  %v206_v3 = vsel %vm204_vm0, 0.0, %v202_v0  ;;  %v209_v4 = vsel %vm208_vm1, 0.0, %v207_v1  ;;  %v857_v12 = vand.u32 127, %v223_v9  ;;  %s462_s4 = sadd.s32 4294967295, %s461_s28  ;;  %s198_s24 = scalar_lea.vmem [#allocation8], %s458_s14 }
  0x5a   : > { %v205_v5 = vsel %vm203_vm2, 0.0, %v201_v2  ;;  %211 = vst [vmem:[#allocation2 + $0x10] sm:$0xff] %v206_v3  ;;  %213 = vst [vmem:[#allocation2 + $0x16] sm:$0xc] %v209_v4  ;;  %v267_v17 = vshrl.u32 %v223_v9, 7  ;;  %v272_v19 = vstv %s462_s4  ;;  %s353_s25 = sshll.u32 %s198_s24, 4  ;;  %s886_s27 = scalar_lea.hbm %s933_s2, %s469_s19  ;;  %s888_s25 = int_to_ptr.vmem [resolvable:$true] %s353_s25 }
  0x5b   : > { %212 = vst [vmem:[#allocation2 + $0x6] sm:$0x3] %v209_v4  ;;  %210 = vst [vmem:[#allocation2 + $0x8] sm:$0xff] %v205_v5  ;;  %vm231_vm3 = vcmp.eq.s32.totalorder %v857_v12, 0  ;;  %vm241_vm4 = vcmp.eq.s32.totalorder %v857_v12, 127  ;;  %vm288_vm1 = vcmp.ge.s32.totalorder %v857_v12, 1 }
  0x5c   : > { %v268_v20 = vadd.s32 8, %v267_v17  ;;  %v269_v21 = vadd.s32 16, %v267_v17  ;;  %v273_v29 = vadd.s32 %v272_v19, %v267_v17  ;;  %vm298_vm2 = vcmp.le.s32.totalorder %v857_v12, 126  ;;  %s340_s13 = scalar_lea.sflag [#allocation5], %s834_s7  ;;  %s598_s29 = scalar_lea.vmem %s888_s25, 256 }
  0x5d   : > { %p599_p12 = scmp.ne.s32.totalorder %s888_s25, %s598_s29  ;;  %p944_p0 = scmp.ne.s32.totalorder %s938_s21, 0 }
  0x5e   : > { %v274_v30 = vadd.s32 %v272_v19, %v268_v20  ;;  %v275_v31 = vadd.s32 %v272_v19, %v269_v21  ;;  %vm276_vm5 = vcmp.ge.s32.totalorder %v273_v29, 0  ;;  %vm279_vm6 = vcmp.lt.s32.totalorder %v273_v29, 48  ;;  %s677_s6 = smov [#allocation8]  }
  0x5f   : > { %vm282_vm12 = vmand %vm276_vm5, %vm279_vm6  ;;  %p600_p10 = pnand %p599_p12, %p944_p0  ;;  %s602_s14 = sshll.u32 %s677_s6, 4  ;;  %s603_s14 = int_to_ptr.vmem [resolvable:$false] %s602_s14 }
  0x60   : > { %vm277_vm7 = vcmp.ge.s32.totalorder %v274_v30, 0  ;;  %vm280_vm8 = vcmp.lt.s32.totalorder %v274_v30, 48  ;;  %vm278_vm9 = vcmp.ge.s32.totalorder %v275_v31, 0  ;;  %vm281_vm11 = vcmp.lt.s32.totalorder %v275_v31, 48  ;;  %s604_s16 = scalar_lea.vmem %s603_s14, 512  ;;  %p605_p4 = scmp.lt.s32.totalorder %s888_s25, %s603_s14 }
  0x61   : > { %v216_v6 = vld [vmem:[#allocation2 + $0x17] sm:$0x3]  ;;  %vm283_vm13 = vmand %vm277_vm7, %vm280_vm8  ;;  %p601_p3 = pneg %p600_p10  ;;  %p606_p5 = scmp.lt.s32.totalorder %s604_s16, %s598_s29 }
  0x62   : > { %v214_v7 = vld [vmem:[#allocation2 + $0x7] sm:$0xff]  ;;  %229 = vrot.lane.b32.xlu1 %v216_v6, %s674_s17  ;;  %v215_v8 = vld [vmem:[#allocation2 + $0xf] sm:$0xff]  ;;  %v247_v13 = vmul.f32 4.0, %v216_v6  ;;  %v222_v27 = vld [vmem:[#allocation2 + $0x18] sm:$0x3] }
  0x63   : > { %225 = vrot.lane.b32.xlu0 %v214_v7, %s674_s17  ;;  %v245_v10 = vmul.f32 4.0, %v214_v7  ;;  %v217_v11 = vld [vmem:[#allocation2 + $0x6] sm:$0xff]  ;;  %v246_v15 = vmul.f32 4.0, %v215_v8  ;;  %v219_v16 = vld [vmem:[#allocation2 + $0x16] sm:$0x3]  ;;  %v218_v18 = vld [vmem:[#allocation2 + $0xe] sm:$0xff]  ;;  %p607_p2 = por %p606_p5, %p605_p4 }
  0x64   : > { %v250_v23 = vsub.f32 %v247_v13, %v219_v16  ;;  %vm284_vm14 = vmand %vm278_vm9, %vm281_vm11 }
  0x65   : > { %v248_v14 = vsub.f32 %v245_v10, %v217_v11  ;;  %v249_v26 = vsub.f32 %v246_v15, %v218_v18  ;;  %p608_p7 = pnand %p607_p2, %p601_p3 }
  0x66   : > { %235 = vrot.lane.b32.xlu1 %v214_v7, %s675_s20  ;;  %v253_v32 = vsub.f32 %v250_v23, %v222_v27 }
  0x67   : > { %227 = vrot.lane.b32.xlu0 %v215_v8, %s674_s17  ;;  %v251_v25 = vsub.f32 %v248_v14, %v205_v5  ;;  %v252_v35 = vsub.f32 %v249_v26, %v206_v3 }
  0x6a   : > { %239 = vrot.lane.b32.xlu1 %v216_v6, %s675_s20 }
  0x6b   : > { %237 = vrot.lane.b32.xlu0 %v215_v8, %s675_s20 }
  0xd4   : > { %v230_v22 = vpop.permute.xlu1 %229 }
  0xd5   : > { %v226_v24 = vpop.permute.xlu0 %225  ;;  %v234_v37 = vsel %vm231_vm3, %v216_v6, %v230_v22 }
  0xd6   : > { %v232_v28 = vsel %vm231_vm3, %v214_v7, %v226_v24  ;;  %v256_v41 = vsub.f32 %v253_v32, %v234_v37 }
  0xd7   : > { %v254_v33 = vsub.f32 %v251_v25, %v232_v28 }
  0xd8   : > { %v236_v34 = vpop.permute.xlu1 %235 }
  0xd9   : > { %v228_v36 = vpop.permute.xlu0 %227  ;;  %v242_v38 = vsel %vm241_vm4, %v214_v7, %v236_v34 }
  0xda   : > { %v233_v39 = vsel %vm231_vm3, %v215_v8, %v228_v36  ;;  %v257_v40 = vsub.f32 %v254_v33, %v242_v38  ;;  %vm317_vm3 = vcmask 1046528  }
  0xdb   : > { %v255_v42 = vsub.f32 %v252_v35, %v233_v39 }
  0xdc   : > { %vm260_vm10 = vcmp.ne.f32.partialorder %v257_v40, 0.0  ;;  %v240_v43 = vpop.permute.xlu1 %239 }
  0xdd   : > { %v238_v44 = vpop.permute.xlu0 %237  ;;  %v244_v45 = vsel %vm241_vm4, %v216_v6, %v240_v43  ;;  %v263_v50 = vsel %vm260_vm10, 1.0, %v676_v49 }
  0xde   : > { %v243_v46 = vsel %vm241_vm4, %v215_v8, %v238_v44  ;;  %v259_v47 = vsub.f32 %v256_v41, %v244_v45  ;;  %v285_v53 = vsel %vm282_vm12, %v263_v50, 0.0  ;;  %vm327_vm4 = vcmask 1045504  }
  0xdf   : > { %v258_v48 = vsub.f32 %v255_v42, %v243_v46 }
  0xe0   : > { %vm262_vm15 = vcmp.ne.f32.partialorder %v259_v47, 0.0 }
  0xe1   : > { %vm261_vm0 = vcmp.ne.f32.partialorder %v258_v48, 0.0  ;;  %v265_v52 = vsel %vm262_vm15, 1.0, %v676_v49 }
  0xe2   : > { %v264_v51 = vsel %vm261_vm0, 1.0, %v676_v49  ;;  %v287_v55 = vsel %vm284_vm14, %v265_v52, 0.0 }
  0xe3   : > { %v286_v54 = vsel %vm283_vm13, %v264_v51, 0.0  ;;  %293 = vrot.lane.b32.xlu1 %v287_v55, %s674_s17 }
  0xe4   : > { %v528_v56 = vpack.i.bf16 %v286_v54, %v285_v53 }
  0xe6   : > { %529 = vrot.lane.b32.xlu0 %v528_v56, %s674_s17 }
  0xe7   : > { %303 = vrot.lane.b32.xlu1 %v287_v55, %s675_s20 }
  0xea   : > { %534 = vrot.lane.b32.xlu0 %v528_v56, %s675_s20 }
 0x155   : > { %v294_v57 = vpop.permute.xlu1 %293 }
 0x156   : > { %v297_v61 = vsel %vm288_vm1, %v294_v57, 0.0 }
 0x158   : > { %v530_v58 = vpop.permute.xlu0 %529 }
 0x159   : > { %v532_v59 = vunpack.i.h.bf16 %v530_v58  ;;  %v304_v60 = vpop.permute.xlu1 %303  ;;  %v531_v62 = vunpack.i.l.bf16 %v530_v58 }
 0x15a   : > { %v307_v63 = vsel %vm298_vm2, %v304_v60, 0.0 }
 0x15b   : > { %v310_v0 = vmax.f32 %v297_v61, %v307_v63  ;;  %v296_v4 = vsel %vm288_vm1, %v532_v59, 0.0  ;;  %v295_v5 = vsel %vm288_vm1, %v531_v62, 0.0 }
 0x15c   : > { %v535_v1 = vpop.permute.xlu0 %534 }
 0x15d   : > { %v537_v2 = vunpack.i.h.bf16 %v535_v1  ;;  %v536_v3 = vunpack.i.l.bf16 %v535_v1  ;;  %v313_v6 = vmax.f32 %v287_v55, %v310_v0 }
 0x15f   : > { %v306_v7 = vsel %vm298_vm2, %v537_v2, 0.0  ;;  %v305_v8 = vsel %vm298_vm2, %v536_v3, 0.0  ;;  %v321_v13 = vrot.slane %v313_v6, 1  ;;  %v331_v18 = vrot.slane %v313_v6, 2 }
 0x160   : > { %v308_v9 = vmax.f32 %v295_v5, %v305_v8  ;;  %v309_v10 = vmax.f32 %v296_v4, %v306_v7 }
 0x162   : > { %v311_v11 = vmax.f32 %v285_v53, %v308_v9  ;;  %v312_v12 = vmax.f32 %v286_v54, %v309_v10 }
 0x164   : > { %v318_v14 = vrot.slane %v311_v11, 1  ;;  %v319_v15 = vrot.slane %v312_v12, 1  ;;  %v328_v16 = vrot.slane %v311_v11, 2  ;;  %v329_v17 = vrot.slane %v312_v12, 2 }
 0x166   : > { %v320_v19 = vsel %vm317_vm3, %v318_v14, %v319_v15  ;;  %v322_v20 = vsel %vm317_vm3, %v319_v15, %v321_v13  ;;  %v330_v23 = vsel %vm327_vm4, %v328_v16, %v329_v17  ;;  %v332_v24 = vsel %vm327_vm4, %v329_v17, %v331_v18 }
 0x167   : > { %v325_v21 = vmax.f32 %v311_v11, %v320_v19  ;;  %v326_v22 = vmax.f32 %v312_v12, %v322_v20 }
 0x169   : > { %v335_v25 = vmax.f32 %v325_v21, %v330_v23  ;;  %v336_v26 = vmax.f32 %v326_v22, %v332_v24 }
 0x16b   : > { %337 = vst [vmem:[%s198_s24] sm:$0xff] %v335_v25  ;;  %338 = vst [vmem:[%s198_s24 + $0x8] sm:$0xff] %v336_v26 }
 0x16c   : > { %611 = shalt.err (!%p608_p7)
}
 0x16d   : > { %s612_s30 = scalar_lea.hbm %s886_s27, 256  ;;  %s616_s8 = scalar_lea.hbm %s933_s2, 768 }
 0x16e   : > { %p613_p11 = scmp.ne.s32.totalorder %s886_s27, %s612_s30  ;;  %p617_p13 = scmp.lt.u32.totalorder %s886_s27, %s933_s2 }
 0x16f   : > { %p618_p9 = scmp.lt.u32.totalorder %s616_s8, %s612_s30  ;;  %p620_p12 = scmp.lt.u32.totalorder %s612_s30, %s886_s27 }
 0x170   : > { %p614_p8 = pnand %p613_p11, %p944_p0 }
 0x171   : > { %p619_p6 = por %p618_p9, %p617_p13 }
 0x172   : > { %p615_p1 = pneg %p614_p8 }
 0x173   : > { %p621_p10 = por %p620_p12, %p619_p6 }
 0x175   : > { %p622_p3 = pnand %p621_p10, %p615_p1 }
 0x177   : > { %625 = shalt.err (!%p622_p3)
}
 0x178   : > { %s678_s28 = smov 128   ;;  %s679_s4 = smov 8  }
 0x179   : > { %474 = dma.vmem_to_hbm [thread:$0]  (%p944_p0), %s888_s25, 256, %s886_s27, %s340_s13, %s678_s28, %s678_s28, %s679_s4  }
 0x17a PF: > { %p488_p4 = scmp.ge.s32.totalorder %s668_s12, 2  ;;  %s368_s19 = sand.u32 1, %s656_s9  }
 0x17b   : > { %p945_p5 = scmp.ne.s32.totalorder %s939_s22, 0  ;;  %s369_s24 = scalar_lea.sflag [#allocation5], %s368_s19 }
 0x17d   : > { %p484_p2 = pnand %p488_p4, %p945_p5 }
 0x17f   : > { %651 = dma.done.wait (!%p484_p2), %s369_s24, 256  }
 0x180   : > { %653 = vsyncadd (!%p484_p2), %s369_s24, 4294967040  ;;  %p18_p7 = scmp.ge.s32.totalorder %s720_s15, 5   ;;  %s946_s9 = smov %s660_s10 }
 0x181   : > { %s947_s10 = smov %s664_s11  ;;  %s948_s11 = smov %s732_s18 }
 0x182   : > { %s949_s12 = smov %s720_s15  ;;  %20 = sbr.rel (!%p18_p7) target bundleno = 7 (0x7), region = 86 }
 0x189   :  { %374 = vsyncpa [#allocation4], 1 }
 0x18a   :  { %376 = vsyncpa [#allocation4 + $0x1], 1 }
 0x18b   :  { %377 = vsyncpa [#allocation7], 1 }
 0x18c   :  { %379 = vsyncpa [#allocation7 + $0x1], 1 }
 0x18d   :  { %380 = vsyncpa [#allocation5], 1 }
 0x18e   :  { %382 = vsyncpa [#allocation5 + $0x1], 1 }

</bundles_post_ra>
